<compile_context>
chip_gen: v7x
topology: tpu7x:2x2x1
jax: 0.10.0
libtpu: 0.0.40
codegen_flags: <defaults>
</compile_context>

<pallas_src>
import functools
import math

import jax
import jax.numpy as jnp
from jax.experimental import pallas as pl
from jax.experimental.pallas import tpu as pltpu


# Logical widths from the PyTorch module and their 128-aligned padded widths.
_H1, _H2 = 400, 300
_H1P, _H2P, _OUTP = 512, 384, 128


def _round_up(x, m):
    return (x + m - 1) // m * m


def _pad_to(x, shape):
    return jnp.pad(x, [(0, t - s) for s, t in zip(x.shape, shape)])


def _softplus(x):
    # Numerically-stable softplus (f32).  torch's threshold=20 linear branch
    # differs by at most ~exp(-20) ~= 2e-9, which is negligible.
    return jnp.maximum(x, 0.0) + jnp.log1p(jnp.exp(-jnp.abs(x)))


# -----------------------------------------------------------------------------
# Pallas kernel: fused 3-layer MLP with softplus activations.
# -----------------------------------------------------------------------------
def _critic_mlp_kernel(x_ref, w1_ref, b1_ref, w2_ref, b2_ref, w3_ref, b3_ref,
                       q_ref):
    # fc1 (state/action already concatenated in the wrapper) + softplus.
    # Matmul operands may be bf16; accumulation and biases are f32.
    h1 = (jnp.dot(x_ref[...], w1_ref[...], preferred_element_type=jnp.float32)
          + b1_ref[...])
    h1 = _softplus(h1).astype(w2_ref.dtype)

    # fc2 + softplus.
    h2 = (jnp.dot(h1, w2_ref[...], preferred_element_type=jnp.float32)
          + b2_ref[...])
    h2 = _softplus(h2).astype(w3_ref.dtype)

    # fc_last (no activation).  Padded output columns are exactly zero.
    q = (jnp.dot(h2, w3_ref[...], preferred_element_type=jnp.float32)
         + b3_ref[...])
    q_ref[...] = q.astype(q_ref.dtype)


# -----------------------------------------------------------------------------
# Parameter preparation (do ONCE per parameter update, not per forward call).
# -----------------------------------------------------------------------------
def prepare_kernel_params(params, num_state, action_dim,
                          compute_dtype=jnp.bfloat16):
    """Pad widths to multiples of 128 and cast matmul operands.

    Padding correctness: padded columns of W1/b1 are zero so padded h1
    columns hold softplus(0)=log(2); the corresponding padded ROWS of W2 are
    zero so nothing leaks downstream (same through W3).  Padded output
    columns of W3/b3 are zero, so q[:, action_dim:] == 0 and is sliced away.
    Biases stay f32 (tiny, VMEM-resident) to avoid quantizing the bias add.
    """
    w1, b1 = params["w1"], params["b1"]       # (S+A, 400), (1, 400)
    w2, b2 = params["w2"], params["b2"]       # (400, 300), (1, 300)
    w3, b3 = params["w3"], params["b3"]       # (300, A),   (1, A)

    sa = num_state + action_dim
    assert w1.shape == (sa, _H1), (w1.shape, sa)
    assert w2.shape == (_H1, _H2), w2.shape
    assert w3.shape == (_H2, action_dim), (w3.shape, action_dim)

    cd = compute_dtype
    return {
        "w1": _pad_to(w1, (sa, _H1P)).astype(cd),
        "b1": _pad_to(b1, (1, _H1P)).astype(jnp.float32),
        "w2": _pad_to(w2, (_H1P, _H2P)).astype(cd),
        "b2": _pad_to(b2, (1, _H2P)).astype(jnp.float32),
        "w3": _pad_to(w3, (_H2P, _OUTP)).astype(cd),
        "b3": _pad_to(b3, (1, _OUTP)).astype(jnp.float32),
    }


# -----------------------------------------------------------------------------
# Wrapper: batch-tiled pallas_call with VMEM-resident weights.
# -----------------------------------------------------------------------------
def critic_forward(state, action, kernel_params, *, block_b=512, min_grid=2):
    """Pallas-backed CriticNetwork.forward (non-image branch).

    kernel_params: output of prepare_kernel_params (pad/cast hoisted out of
                   the per-call path; jit this function so the concat/pad of
                   activations fuses).
    block_b:       max rows per grid step.  512 is fine on v5e/v6e/v7x for
                   this footprint (well under the scoped VMEM limit).
    min_grid:      minimum number of grid steps for large batches so both
                   v7x TensorCores get work on the "parallel" axis.

    Note: the original module computes a = (action - mean) / halfwidth but the
    non-image forward never uses it, so it is intentionally omitted here.
    """
    B, S = state.shape
    A = action.shape[1]
    SA = S + A

    kp = kernel_params
    cd = kp["w1"].dtype
    assert kp["w1"].shape == (SA, _H1P), (kp["w1"].shape, SA)

    # Balanced batch tiles: bound padding waste per tile and keep >= min_grid
    # steps when the batch is big enough for the split to be worthwhile.
    row_align = 8 if jnp.dtype(cd).itemsize >= 4 else 16
    n_tiles = pl.cdiv(B, block_b)
    if B >= min_grid * 128:
        n_tiles = max(n_tiles, min_grid)
    tb = _round_up(pl.cdiv(B, n_tiles), row_align)
    b_pad = _round_up(B, tb)
    grid = (b_pad // tb,)

    # Concat fused in the wrapper -> single (b_pad, S+A) activation stream.
    x = jnp.concatenate([state, action], axis=1)
    x_p = _pad_to(x, (b_pad, SA)).astype(cd)

    def resident(shape):
        return pl.BlockSpec(shape, lambda i: (0, 0))

    # Advisory cost estimate for XLA's scheduler.
    icd = jnp.dtype(cd).itemsize
    flops = 2 * b_pad * (SA * _H1P + _H1P * _H2P + _H2P * _OUTP)
    transcendentals = 2 * b_pad * (_H1P + _H2P)          # exp + log1p
    bytes_accessed = (
        icd * (b_pad * SA + SA * _H1P + _H1P * _H2P + _H2P * _OUTP)
        + 4 * (_H1P + _H2P + _OUTP)                      # f32 biases
        + 4 * b_pad * _OUTP                              # f32 output slab
    )

    q_pad = pl.pallas_call(
        _critic_mlp_kernel,
        out_shape=jax.ShapeDtypeStruct((b_pad, _OUTP), jnp.float32),
        grid_spec=pltpu.PrefetchScalarGridSpec(
            num_scalar_prefetch=0,
            grid=grid,
            in_specs=[
                pl.BlockSpec((tb, SA), lambda i: (i, 0)),  # [state|action] tile
                resident((SA, _H1P)),                      # w1
                resident((1, _H1P)),                       # b1 (f32)
                resident((_H1P, _H2P)),                    # w2
                resident((1, _H2P)),                       # b2 (f32)
                resident((_H2P, _OUTP)),                   # w3
                resident((1, _OUTP)),                      # b3 (f32)
            ],
            out_specs=pl.BlockSpec((tb, _OUTP), lambda i: (i, 0)),
        ),
        compiler_params=pltpu.CompilerParams(
            dimension_semantics=("parallel",)),
        cost_estimate=pl.CostEstimate(
            flops=flops,
            transcendentals=transcendentals,
            bytes_accessed=bytes_accessed),
    )(x_p, kp["w1"], kp["b1"], kp["w2"], kp["b2"], kp["w3"], kp["b3"])

    # Lane-dense f32 slab -> logical (B, A) output.
    return q_pad[:B, :A]


# -----------------------------------------------------------------------------
# Deterministic parameter construction (shapes from CriticNetwork.__init__).
# -----------------------------------------------------------------------------
def init_params(key, num_state, action_dim, action_low, action_high):
    k1, k2, k3, k4, k5, k6 = jax.random.split(key, 6)

    def _linear(kw, kb, fan_in, fan_out):
        # PyTorch nn.Linear default init: U(-1/sqrt(fan_in), 1/sqrt(fan_in)).
        bound = 1.0 / math.sqrt(fan_in)
        w = jax.random.uniform(kw, (fan_in, fan_out), jnp.float32, -bound, bound)
        b = jax.random.uniform(kb, (1, fan_out), jnp.float32, -bound, bound)
        return w, b

    in1 = num_state + action_dim
    w1, b1 = _linear(k1, k2, in1, _H1)
    w2, b2 = _linear(k3, k4, _H1, _H2)
    # util.critic_last_layer_init: small uniform init for the last layer.
    w3 = jax.random.uniform(k5, (_H2, action_dim), jnp.float32, -3e-3, 3e-3)
    b3 = jax.random.uniform(k6, (1, action_dim), jnp.float32, -3e-3, 3e-3)

    action_mean = 0.5 * (action_high + action_low)
    action_halfwidth = 0.5 * (action_high - action_low)

    return {
        "w1": w1, "b1": b1,
        "w2": w2, "b2": b2,
        "w3": w3, "b3": b3,
        "action_mean": action_mean,
        "action_halfwidth": action_halfwidth,
    }


# -----------------------------------------------------------------------------
# Pure-JAX reference for correctness checks.
# -----------------------------------------------------------------------------
def critic_forward_ref(state, action, params):
    x = jnp.concatenate([state, action], axis=1)
    h1 = jax.nn.softplus(x @ params["w1"] + params["b1"])
    h2 = jax.nn.softplus(h1 @ params["w2"] + params["b2"])
    return h2 @ params["w3"] + params["b3"]


if __name__ == "__main__":
    B = 2           # batch
    NUM_STATE = 8   # state features
    ACT_DIM = 2     # action_space.shape[0]

    key = jax.random.PRNGKey(0)
    k_state, k_action, k_params = jax.random.split(key, 3)

    action_low = -2.0 * jnp.ones((ACT_DIM,), jnp.float32)
    action_high = 2.0 * jnp.ones((ACT_DIM,), jnp.float32)

    params = init_params(k_params, NUM_STATE, ACT_DIM, action_low, action_high)

    state = jax.random.normal(k_state, (B, NUM_STATE), jnp.float32)
    action = jax.random.uniform(k_action, (B, ACT_DIM), jnp.float32,
                                minval=-2.0, maxval=2.0)

    q_ref = critic_forward_ref(state, action, params)

    fwd = jax.jit(functools.partial(critic_forward, block_b=512))

    # Default bf16-operand path (MXU-native on v5e/v6e/v7x, f32 accumulation).
    kp_bf16 = prepare_kernel_params(params, NUM_STATE, ACT_DIM, jnp.bfloat16)
    q_bf16 = jax.block_until_ready(fwd(state, action, kp_bf16))
    assert q_bf16.shape == (B, ACT_DIM)
    assert jnp.allclose(q_bf16, q_ref, atol=2e-2, rtol=2e-2), (q_bf16, q_ref)

    # Exact-semantics f32 path (matches the PyTorch module tightly).
    kp_f32 = prepare_kernel_params(params, NUM_STATE, ACT_DIM, jnp.float32)
    q_f32 = jax.block_until_ready(fwd(state, action, kp_f32))
    assert q_f32.shape == (B, ACT_DIM)
    assert jnp.allclose(q_f32, q_ref, atol=1e-4, rtol=1e-4), (q_f32, q_ref)

    # TODO(synk): the is_image=True branch (conv1/conv2/conv3 + softplus) is not
    # implemented here; the non-image DDPG critic MLP path is the one exercised.
    print("KERNEL_OK")
</pallas_src>

<mosaic_0001>
module attributes {stable_mosaic.version = 11 : i64} {
  func.func @_critic_mlp_kernel(%arg0: i32, %arg1: memref<16x10xbf16, #tpu.memory_space<vmem>>, %arg2: memref<10x512xbf16, #tpu.memory_space<vmem>>, %arg3: memref<1x512xf32, #tpu.memory_space<vmem>>, %arg4: memref<512x384xbf16, #tpu.memory_space<vmem>>, %arg5: memref<1x384xf32, #tpu.memory_space<vmem>>, %arg6: memref<384x128xbf16, #tpu.memory_space<vmem>>, %arg7: memref<1x128xf32, #tpu.memory_space<vmem>>, %arg8: memref<16x128xf32, #tpu.memory_space<vmem>>) attributes {dimension_semantics = [#tpu.dimension_semantics<parallel>], iteration_bounds = array<i64: 1>, scalar_prefetch = 0 : i64, scratch_operands = 0 : i64, tpu.core_type = #tpu.core_type<tc>, window_params = [{transform_indices = @transform_0, window_bounds = array<i64: 16, 10>}, {pipeline_mode = #tpu.pipeline_mode<synchronous>, transform_indices = @transform_1, window_bounds = array<i64: 10, 512>}, {pipeline_mode = #tpu.pipeline_mode<synchronous>, transform_indices = @transform_2, window_bounds = array<i64: 1, 512>}, {pipeline_mode = #tpu.pipeline_mode<synchronous>, transform_indices = @transform_3, window_bounds = array<i64: 512, 384>}, {pipeline_mode = #tpu.pipeline_mode<synchronous>, transform_indices = @transform_4, window_bounds = array<i64: 1, 384>}, {pipeline_mode = #tpu.pipeline_mode<synchronous>, transform_indices = @transform_5, window_bounds = array<i64: 384, 128>}, {pipeline_mode = #tpu.pipeline_mode<synchronous>, transform_indices = @transform_6, window_bounds = array<i64: 1, 128>}, {transform_indices = @transform_7, window_bounds = array<i64: 16, 128>}]} {
    %c0 = arith.constant 0 : index
    %c0_0 = arith.constant 0 : index
    %0 = vector.load %arg1[%c0, %c0_0] : memref<16x10xbf16, #tpu.memory_space<vmem>>, vector<16x10xbf16>
    %c0_1 = arith.constant 0 : index
    %c0_2 = arith.constant 0 : index
    %1 = vector.load %arg2[%c0_1, %c0_2] : memref<10x512xbf16, #tpu.memory_space<vmem>>, vector<10x512xbf16>
    %cst = arith.constant dense<0.000000e+00> : vector<16x512xf32>
    %2 = tpu.matmul %0, %1, %cst {dimension_numbers = #tpu.dot_dimension_numbers<[1], [0], [0], [1], [0, 0, 1, 1], [], []>} : vector<16x10xbf16>, vector<10x512xbf16>, vector<16x512xf32> -> vector<16x512xf32>
    %c0_3 = arith.constant 0 : index
    %c0_4 = arith.constant 0 : index
    %3 = vector.load %arg3[%c0_3, %c0_4] : memref<1x512xf32, #tpu.memory_space<vmem>>, vector<1x512xf32>
    %4 = vector.broadcast %3 : vector<1x512xf32> to vector<16x512xf32>
    %5 = arith.addf %2, %4 : vector<16x512xf32>
    %cst_5 = arith.constant 0.000000e+00 : f32
    %6 = vector.broadcast %cst_5 : f32 to vector<16x512xf32>
    %7 = arith.maximumf %5, %6 : vector<16x512xf32>
    %8 = math.absf %5 : vector<16x512xf32>
    %cst_6 = arith.constant 0.000000e+00 : f32
    %9 = vector.broadcast %cst_6 : f32 to vector<16x512xf32>
    %10 = arith.subf %9, %8 : vector<16x512xf32>
    %11 = math.exp %10 : vector<16x512xf32>
    %12 = math.log1p %11 : vector<16x512xf32>
    %13 = arith.addf %7, %12 : vector<16x512xf32>
    %14 = arith.truncf %13 : vector<16x512xf32> to vector<16x512xbf16>
    %c0_7 = arith.constant 0 : index
    %c0_8 = arith.constant 0 : index
    %15 = vector.load %arg4[%c0_7, %c0_8] : memref<512x384xbf16, #tpu.memory_space<vmem>>, vector<512x384xbf16>
    %cst_9 = arith.constant dense<0.000000e+00> : vector<16x384xf32>
    %16 = tpu.matmul %14, %15, %cst_9 {dimension_numbers = #tpu.dot_dimension_numbers<[1], [0], [0], [1], [0, 0, 1, 1], [], []>} : vector<16x512xbf16>, vector<512x384xbf16>, vector<16x384xf32> -> vector<16x384xf32>
    %c0_10 = arith.constant 0 : index
    %c0_11 = arith.constant 0 : index
    %17 = vector.load %arg5[%c0_10, %c0_11] : memref<1x384xf32, #tpu.memory_space<vmem>>, vector<1x384xf32>
    %18 = vector.broadcast %17 : vector<1x384xf32> to vector<16x384xf32>
    %19 = arith.addf %16, %18 : vector<16x384xf32>
    %cst_12 = arith.constant 0.000000e+00 : f32
    %20 = vector.broadcast %cst_12 : f32 to vector<16x384xf32>
    %21 = arith.maximumf %19, %20 : vector<16x384xf32>
    %22 = math.absf %19 : vector<16x384xf32>
    %cst_13 = arith.constant 0.000000e+00 : f32
    %23 = vector.broadcast %cst_13 : f32 to vector<16x384xf32>
    %24 = arith.subf %23, %22 : vector<16x384xf32>
    %25 = math.exp %24 : vector<16x384xf32>
    %26 = math.log1p %25 : vector<16x384xf32>
    %27 = arith.addf %21, %26 : vector<16x384xf32>
    %28 = arith.truncf %27 : vector<16x384xf32> to vector<16x384xbf16>
    %c0_14 = arith.constant 0 : index
    %c0_15 = arith.constant 0 : index
    %29 = vector.load %arg6[%c0_14, %c0_15] : memref<384x128xbf16, #tpu.memory_space<vmem>>, vector<384x128xbf16>
    %cst_16 = arith.constant dense<0.000000e+00> : vector<16x128xf32>
    %30 = tpu.matmul %28, %29, %cst_16 {dimension_numbers = #tpu.dot_dimension_numbers<[1], [0], [0], [1], [0, 0, 1, 1], [], []>} : vector<16x384xbf16>, vector<384x128xbf16>, vector<16x128xf32> -> vector<16x128xf32>
    %c0_17 = arith.constant 0 : index
    %c0_18 = arith.constant 0 : index
    %31 = vector.load %arg7[%c0_17, %c0_18] : memref<1x128xf32, #tpu.memory_space<vmem>>, vector<1x128xf32>
    %32 = vector.broadcast %31 : vector<1x128xf32> to vector<16x128xf32>
    %33 = arith.addf %30, %32 : vector<16x128xf32>
    %c0_19 = arith.constant 0 : index
    %c0_20 = arith.constant 0 : index
    %34 = vector.load %arg8[%c0_19, %c0_20] : memref<16x128xf32, #tpu.memory_space<vmem>>, vector<16x128xf32>
    tpu.vector_store %arg8[%c0_19, %c0_20], %33 {strides = array<i32>} : memref<16x128xf32, #tpu.memory_space<vmem>>, vector<16x128xf32>,
    return
  }
  func.func @transform_0(%arg0: i32) -> (i32, i32) {
    %c0_i32 = arith.constant 0 : i32
    %c0_i32_0 = arith.constant 0 : i32
    return %arg0, %c0_i32 : i32, i32
  }
  func.func @transform_1(%arg0: i32) -> (i32, i32) {
    %c0_i32 = arith.constant 0 : i32
    %c0_i32_0 = arith.constant 0 : i32
    %c0_i32_1 = arith.constant 0 : i32
    return %c0_i32, %c0_i32_0 : i32, i32
  }
  func.func @transform_2(%arg0: i32) -> (i32, i32) {
    %c0_i32 = arith.constant 0 : i32
    %c0_i32_0 = arith.constant 0 : i32
    %c0_i32_1 = arith.constant 0 : i32
    return %c0_i32, %c0_i32_0 : i32, i32
  }
  func.func @transform_3(%arg0: i32) -> (i32, i32) {
    %c0_i32 = arith.constant 0 : i32
    %c0_i32_0 = arith.constant 0 : i32
    %c0_i32_1 = arith.constant 0 : i32
    return %c0_i32, %c0_i32_0 : i32, i32
  }
  func.func @transform_4(%arg0: i32) -> (i32, i32) {
    %c0_i32 = arith.constant 0 : i32
    %c0_i32_0 = arith.constant 0 : i32
    %c0_i32_1 = arith.constant 0 : i32
    return %c0_i32, %c0_i32_0 : i32, i32
  }
  func.func @transform_5(%arg0: i32) -> (i32, i32) {
    %c0_i32 = arith.constant 0 : i32
    %c0_i32_0 = arith.constant 0 : i32
    %c0_i32_1 = arith.constant 0 : i32
    return %c0_i32, %c0_i32_0 : i32, i32
  }
  func.func @transform_6(%arg0: i32) -> (i32, i32) {
    %c0_i32 = arith.constant 0 : i32
    %c0_i32_0 = arith.constant 0 : i32
    %c0_i32_1 = arith.constant 0 : i32
    return %c0_i32, %c0_i32_0 : i32, i32
  }
  func.func @transform_7(%arg0: i32) -> (i32, i32) {
    %c0_i32 = arith.constant 0 : i32
    %c0_i32_0 = arith.constant 0 : i32
    return %arg0, %c0_i32 : i32, i32
  }
}

</mosaic_0001>

<bundles_post_ra>
// kernel: critic_forward.1
= control target key start
LH: loop header
LB: loop body
LE: loop exit
PB: predicated region body
PF: predicated region fallthrough
CT: control target
= control target key end

     0   :  { %12 = vsyncpa [#allocation3], 0  ;;  %s2419_s0 = inlined_call_operand.vmem [shape: bf16[16,10], index: 0, kind: input, shape index: {}]   ;;  %s2420_s1 = inlined_call_operand.vmem [shape: bf16[10,512], index: 1, kind: input, shape index: {}]   ;;  %s2421_s2 = inlined_call_operand.vmem [shape: f32[1,512], index: 2, kind: input, shape index: {}]   ;;  %s2422_s3 = inlined_call_operand.hbm [shape: bf16[512,384], index: 3, kind: input, shape index: {}]   ;;  %s2423_s4 = inlined_call_operand.hbm [shape: f32[1,384], index: 4, kind: input, shape index: {}]   ;;  %s2424_s5 = inlined_call_operand.hbm [shape: bf16[384,128], index: 5, kind: input, shape index: {}]   ;;  %s2425_s6 = inlined_call_operand.hbm [shape: f32[1,128], index: 6, kind: input, shape index: {}]   ;;  %s2426_s7 = inlined_call_operand.vmem [shape: f32[16,128], index: 7, kind: output, shape index: {}]  }
   0x1   :  { %13 = vsyncpa [#allocation5], 0 }
   0x2   :  { %14 = vsyncpa [#allocation8], 0  ;;  %s2115_s24 = smov [#allocation4]   ;;  %s2116_s26 = smov [#allocation2]  }
   0x3   :  { %s39_s25 = sshll.u32 %s2115_s24, 4  ;;  %s26_s27 = sshll.u32 %s2116_s26, 4  ;;  %s40_s25 = int_to_ptr.vmem [resolvable:$true] %s39_s25  ;;  %s2166_s27 = int_to_ptr.vmem [resolvable:$true] %s26_s27 }
   0x4   :  { %s2021_s30 = scalar_lea.hbm %s2423_s4, 48 }
   0x5   :  { %p2022_p0 = scmp.ne.s32.totalorder %s2423_s4, %s2021_s30  ;;  %p2025_p1 = scmp.lt.u32.totalorder %s2021_s30, %s2423_s4 }
   0x7   :  { %p2027_p2 = pnand %p2025_p1, %p2022_p0 }
   0x9   :  { %2030 = shalt.err (!%p2027_p2)
}
   0xa   :  { %s2031_s12 = scalar_lea.vmem %s40_s25, 48  ;;  %s2035_s13 = scalar_lea.vmem %s40_s25, 64 }
   0xb   :  { %p2032_p3 = scmp.ne.s32.totalorder %s40_s25, %s2031_s12  ;;  %p2036_p4 = scmp.lt.s32.totalorder %s40_s25, %s40_s25 }
   0xc   :  { %p2037_p5 = scmp.lt.s32.totalorder %s2035_s13, %s2031_s12 }
   0xe   :  { %p2038_p6 = por %p2037_p5, %p2036_p4 }
  0x10   :  { %p2039_p7 = pnand %p2038_p6, %p2032_p3 }
  0x12   :  { %2042 = shalt.err (!%p2039_p7)
}
  0x13   :  { %42 = dma.hbm_to_vmem [thread:$0]  %s2423_s4, 48, %s40_s25, [#allocation5]  }
  0x14   :  { %s2043_s18 = scalar_lea.hbm %s2422_s3, 12288 }
  0x15   :  { %p2044_p8 = scmp.ne.s32.totalorder %s2422_s3, %s2043_s18  ;;  %p2047_p9 = scmp.lt.u32.totalorder %s2043_s18, %s2422_s3 }
  0x17   :  { %p2049_p10 = pnand %p2047_p9, %p2044_p8 }
  0x19   :  { %2052 = shalt.err (!%p2049_p10)
}
  0x1a   :  { %s2053_s23 = scalar_lea.vmem %s2166_s27, 12288  ;;  %p2058_p12 = scmp.lt.s32.totalorder %s2166_s27, %s2166_s27 }
  0x1b   :  { %p2054_p11 = scmp.ne.s32.totalorder %s2166_s27, %s2053_s23  ;;  %p2059_p13 = scmp.lt.s32.totalorder %s2053_s23, %s2053_s23 }
  0x1d   :  { %p2060_p0 = por %p2059_p13, %p2058_p12 }
  0x1f   :  { %p2061_p1 = pnand %p2060_p0, %p2054_p11 }
  0x21   :  { %2064 = shalt.err (!%p2061_p1)
}
  0x22   :  { %s2117_s4 = smov 192   ;;  %s2118_s24 = smov 12  }
  0x23   :  { %32 = dma.hbm_to_vmem [thread:$0]  %s2422_s3, 12288, %s2166_s27, [#allocation3], %s2117_s4, %s2117_s4, %s2118_s24  }
  0x24   :  { %s2119_s28 = smov [#allocation6]   ;;  %s2065_s9 = scalar_lea.hbm %s2424_s5, 3072 }
  0x25   :  { %s48_s29 = sshll.u32 %s2119_s28, 4  ;;  %p2066_p2 = scmp.ne.s32.totalorder %s2424_s5, %s2065_s9  ;;  %s49_s29 = int_to_ptr.vmem [resolvable:$true] %s48_s29 }
  0x26   :  { %p2069_p3 = scmp.lt.u32.totalorder %s2065_s9, %s2424_s5 }
  0x28   :  { %p2071_p4 = pnand %p2069_p3, %p2066_p2 }
  0x2a   :  { %2074 = shalt.err (!%p2071_p4)
}
  0x2b   :  { %s2075_s14 = scalar_lea.vmem %s49_s29, 3072  ;;  %p2080_p6 = scmp.lt.s32.totalorder %s49_s29, %s49_s29 }
  0x2c   :  { %p2076_p5 = scmp.ne.s32.totalorder %s49_s29, %s2075_s14  ;;  %p2081_p7 = scmp.lt.s32.totalorder %s2075_s14, %s2075_s14 }
  0x2e   :  { %p2082_p8 = por %p2081_p7, %p2080_p6 }
  0x30   :  { %p2083_p9 = pnand %p2082_p8, %p2076_p5 }
  0x32   :  { %2086 = shalt.err (!%p2083_p9)
}
  0x33   :  { %s2120_s3 = smov 64   ;;  %s2121_s27 = smov 4  }
  0x34   :  { %54 = dma.hbm_to_vmem [thread:$0]  %s2424_s5, 3072, %s49_s29, [#allocation5], %s2120_s3, %s2120_s3, %s2121_s27  }
  0x35   :  { %s2122_s17 = smov [#allocation7]   ;;  %s2087_s21 = scalar_lea.hbm %s2425_s6, 16 }
  0x36   :  { %s61_s18 = sshll.u32 %s2122_s17, 4  ;;  %p2088_p10 = scmp.ne.s32.totalorder %s2425_s6, %s2087_s21  ;;  %s62_s18 = int_to_ptr.vmem [resolvable:$true] %s61_s18 }
  0x37   :  { %p2091_p11 = scmp.lt.u32.totalorder %s2087_s21, %s2425_s6 }
  0x39   :  { %p2093_p12 = pnand %p2091_p11, %p2088_p10 }
  0x3b   :  { %2096 = shalt.err (!%p2093_p12)
}
  0x3c   :  { %s2097_s25 = scalar_lea.vmem %s62_s18, 16  ;;  %s2101_s5 = scalar_lea.vmem %s62_s18, 32 }
  0x3d   :  { %p2098_p13 = scmp.ne.s32.totalorder %s62_s18, %s2097_s25  ;;  %p2102_p0 = scmp.lt.s32.totalorder %s62_s18, %s62_s18 }
  0x3e   :  { %p2103_p1 = scmp.lt.s32.totalorder %s2101_s5, %s2097_s25 }
  0x40   :  { %p2104_p2 = por %p2103_p1, %p2102_p0 }
  0x42   :  { %p2105_p3 = pnand %p2104_p2, %p2098_p13 }
  0x44   :  { %2108 = shalt.err (!%p2105_p3)
}
  0x45   :  { %64 = dma.hbm_to_vmem [thread:$0]  %s2425_s6, 16, %s62_s18, [#allocation8]  }
  0x46   :  { %2109 = dma.done.wait [#allocation3], 12288  }
  0x47   :  { %2110 = vsyncadd [#allocation3], 4294955008 }
  0x48   :  { %2111 = dma.done.wait [#allocation5], 3120  }
  0x49   :  { %2112 = vsyncadd [#allocation5], 4294964176 }
  0x4a   :  { %2113 = dma.done.wait [#allocation8], 16  }
  0x4b   :  { %2114 = vsyncadd [#allocation8], 4294967280  ;;  %v2123_v0 = vmov 0   ;;  %vm131_vm0 = vcmask 1044480   ;;  %v1809_v3 = vld [vmem:[%s2419_s0] sm:$0xff]   ;;  %vm127_vm1 = vcmask 80896   ;;  %v86_v58 = vlaneseq }
  0x4c   :  { %176 = vmatprep.mubr.bf16.mxu0 %v2123_v0  ;;  %219 = vmatprep.mubr.bf16.mxu1 %v2123_v0  ;;  %v1806_v1 = vld [vmem:[%s2420_s1 + $0x4] ss:$16 sps:$4 sm:$0x1f]   ;;  %v1808_v2 = vld [vmem:[%s2420_s1] ss:$16 sps:$4 sm:$0x1f]  }
  0x4d   :  { %1567 = vmatprep.subr.msk.bf16.mxu0 %vm131_vm0, %v1806_v1  ;;  %v133_v4 = vsel %vm131_vm0, %v1808_v2, 0  ;;  %v1810_v5 = vld [vmem:[%s2420_s1 + $0xc] ss:$16 sps:$4 sm:$0x1f]   ;;  %v1815_v8 = vld [vmem:[#allocation2 + $0x4] ss:$12 sps:$4 sm:$0xff]  }
  0x4e   :  { %145 = vmatpush1.bf16.msra.mxu0 %v133_v4  ;;  %v1812_v6 = vld [vmem:[%s2420_s1 + $0x8] ss:$16 sps:$4 sm:$0x1f]   ;;  %1569 = vmatprep.subr.msk.bf16.mxu1 %vm131_vm0, %v1810_v5  ;;  %v1813_v7 = vld [vmem:[#allocation2] ss:$12 sps:$4 sm:$0xff]   ;;  %v2236_v59 = vshrl.u32 %v86_v58, 7 }
  0x4f   :  { %v139_v9 = vsel %vm131_vm0, %v1812_v6, 0  ;;  %v1818_v10 = vld [vmem:[#allocation2 + $0x1c] ss:$12 sps:$4 sm:$0xff]   ;;  %1011 = vmatprep.subr.bf16.mxu0 %v1815_v8  ;;  %v1816_v11 = vld [vmem:[#allocation2 + $0x18] ss:$12 sps:$4 sm:$0xff]   ;;  %vm2125_vm0 = vmmov 0  }
  0x50   :  { %188 = vmatpush1.bf16.msra.mxu1 %v139_v9  ;;  %v1821_v12 = vld [vmem:[#allocation2 + $0x34] ss:$12 sps:$4 sm:$0xff]   ;;  %v1819_v13 = vld [vmem:[#allocation2 + $0x30] ss:$12 sps:$4 sm:$0xff]   ;;  %v1824_v14 = vld [vmem:[#allocation2 + $0x4c] ss:$12 sps:$4 sm:$0xff]  }
  0x51   :  { %1568 = vmatmul.mubr.msk.bf16.vlgmr.msra.gmra.mrb[0].mxu0 %vm127_vm1, %v1809_v3  ;;  %v1822_v15 = vld [vmem:[#allocation2 + $0x48] ss:$12 sps:$4 sm:$0xff]   ;;  %v1827_v16 = vld [vmem:[#allocation2 + $0x64] ss:$12 sps:$4 sm:$0xff]   ;;  %v1825_v17 = vld [vmem:[#allocation2 + $0x60] ss:$12 sps:$4 sm:$0xff]  }
  0x52   :  { %1012 = vmatpush1.bf16.msra.mxu0 %v1813_v7  ;;  %v1830_v18 = vld [vmem:[#allocation2 + $0x7c] ss:$12 sps:$4 sm:$0xff]   ;;  %v1828_v19 = vld [vmem:[#allocation2 + $0x78] ss:$12 sps:$4 sm:$0xff]   ;;  %v1833_v20 = vld [vmem:[#allocation2 + $0x94] ss:$12 sps:$4 sm:$0xff]  }
  0x53   :  { %1570 = vmatmul.mubr.msk.bf16.vlgmr.msra.gmra.mrb[0].mxu1 %vm127_vm1, %v1809_v3  ;;  %1013 = vmatprep.subr.bf16.mxu0 %v1818_v10  ;;  %v1831_v21 = vld [vmem:[#allocation2 + $0x90] ss:$12 sps:$4 sm:$0xff]   ;;  %v1836_v22 = vld [vmem:[#allocation2 + $0xac] ss:$12 sps:$4 sm:$0xff]   ;;  %v1834_v23 = vld [vmem:[#allocation2 + $0xa8] ss:$12 sps:$4 sm:$0xff]  }
  0x54   :  { %v1839_v24 = vld [vmem:[#allocation2 + $0xc4] ss:$12 sps:$4 sm:$0xff]   ;;  %v1840_v25 = vld [vmem:[#allocation2 + $0xc8] ss:$12 sps:$4 sm:$0xff]   ;;  %v1837_v26 = vld [vmem:[#allocation2 + $0xc0] ss:$12 sps:$4 sm:$0xff]  }
  0x55   :  { %v1841_v27 = vld [vmem:[#allocation2 + $0x8] ss:$12 sps:$4 sm:$0xff]   ;;  %1692 = vmatprep.subr.bf16.mxu1 %v1840_v25  ;;  %v1845_v29 = vld [vmem:[#allocation2 + $0xe0] ss:$12 sps:$4 sm:$0xff]   ;;  %v1842_v30 = vld [vmem:[#allocation2 + $0xd8] ss:$12 sps:$4 sm:$0xff]  }
  0x56   :  { %1014 = vmatpush1.bf16.msra.mxu0 %v1816_v11  ;;  %1693 = vmatpush3.bf16.msra.mxu1 %v1841_v27  ;;  %v1844_v28 = vld [vmem:[#allocation2 + $0xdc] ss:$12 sps:$4 sm:$0xff]   ;;  %v1846_v31 = vld [vmem:[#allocation2 + $0x20] ss:$12 sps:$4 sm:$0xff]   ;;  %v1850_v33 = vld [vmem:[#allocation2 + $0xf8] ss:$12 sps:$4 sm:$0xff]  }
  0x57   :  { %1015 = vmatprep.subr.bf16.mxu0 %v1821_v12  ;;  %1694 = vmatprep.subr.bf16.mxu1 %v1845_v29  ;;  %v1849_v32 = vld [vmem:[#allocation2 + $0xf4] ss:$12 sps:$4 sm:$0xff]   ;;  %v1847_v34 = vld [vmem:[#allocation2 + $0xf0] ss:$12 sps:$4 sm:$0xff]   ;;  %v1851_v35 = vld [vmem:[#allocation2 + $0x38] ss:$12 sps:$4 sm:$0xff]  }
  0x58   :  { %v1854_v36 = vld [vmem:[#allocation2 + $0x10c] ss:$12 sps:$4 sm:$0xff]   ;;  %v1855_v37 = vld [vmem:[#allocation2 + $0x110] ss:$12 sps:$4 sm:$0xff]   ;;  %v1852_v38 = vld [vmem:[#allocation2 + $0x108] ss:$12 sps:$4 sm:$0xff]  }
  0x59   :  { %v1856_v39 = vld [vmem:[#allocation2 + $0x50] ss:$12 sps:$4 sm:$0xff]   ;;  %v1860_v41 = vld [vmem:[#allocation2 + $0x128] ss:$12 sps:$4 sm:$0xff]   ;;  %v1857_v42 = vld [vmem:[#allocation2 + $0x120] ss:$12 sps:$4 sm:$0xff]  }
  0x5a   :  { %1016 = vmatpush1.bf16.msra.mxu0 %v1819_v13  ;;  %1695 = vmatpush3.bf16.msra.mxu1 %v1846_v31  ;;  %v1859_v40 = vld [vmem:[#allocation2 + $0x124] ss:$12 sps:$4 sm:$0xff]   ;;  %v1861_v43 = vld [vmem:[#allocation2 + $0x68] ss:$12 sps:$4 sm:$0xff]   ;;  %v1865_v45 = vld [vmem:[#allocation2 + $0x140] ss:$12 sps:$4 sm:$0xff]  }
  0x5b   :  { %1017 = vmatprep.subr.bf16.mxu0 %v1824_v14  ;;  %1696 = vmatprep.subr.bf16.mxu1 %v1850_v33  ;;  %v1864_v44 = vld [vmem:[#allocation2 + $0x13c] ss:$12 sps:$4 sm:$0xff]   ;;  %v1862_v46 = vld [vmem:[#allocation2 + $0x138] ss:$12 sps:$4 sm:$0xff]   ;;  %v1866_v47 = vld [vmem:[#allocation2 + $0x80] ss:$12 sps:$4 sm:$0xff]  }
  0x5c   :  { %v1869_v48 = vld [vmem:[#allocation2 + $0x154] ss:$12 sps:$4 sm:$0xff]   ;;  %v1870_v49 = vld [vmem:[#allocation2 + $0x158] ss:$12 sps:$4 sm:$0xff]   ;;  %v1867_v50 = vld [vmem:[#allocation2 + $0x150] ss:$12 sps:$4 sm:$0xff]  }
  0x5d   :  { %v1871_v51 = vld [vmem:[#allocation2 + $0x98] ss:$12 sps:$4 sm:$0xff]   ;;  %v1875_v53 = vld [vmem:[#allocation2 + $0x170] ss:$12 sps:$4 sm:$0xff]   ;;  %v1872_v54 = vld [vmem:[#allocation2 + $0x168] ss:$12 sps:$4 sm:$0xff]  }
  0x5e   :  { %1018 = vmatpush1.bf16.msra.mxu0 %v1822_v15  ;;  %1697 = vmatpush3.bf16.msra.mxu1 %v1851_v35  ;;  %v1874_v52 = vld [vmem:[#allocation2 + $0x16c] ss:$12 sps:$4 sm:$0xff]   ;;  %v1876_v55 = vld [vmem:[#allocation2 + $0xb0] ss:$12 sps:$4 sm:$0xff]   ;;  %v1880_v57 = vld [vmem:[#allocation2 + $0x248] ss:$12 sps:$4 sm:$0xff]  }
  0x5f   :  { %1019 = vmatprep.subr.bf16.mxu0 %v1827_v16  ;;  %1698 = vmatprep.subr.bf16.mxu1 %v1855_v37  ;;  %v1879_v56 = vld [vmem:[#allocation2 + $0x184] ss:$12 sps:$4 sm:$0xff]   ;;  %v88_v60 = vsub.s32 0, %v2236_v59  ;;  %v84_v61 = vld [vmem:[%s2421_s2] sm:$0xf]  ;;  %v92_v62 = vsub.s32 1, %v2236_v59 }
  0x60   :  { %v96_v63 = vsub.s32 2, %v2236_v59  ;;  %v100_v1 = vsub.s32 3, %v2236_v59 }
  0x61   :  { %v89_v0 = vrot.slane %v84_v61, %v88_v60  ;;  %v93_v2 = vrot.slane %v84_v61, %v92_v62 }
  0x62   :  { %1020 = vmatpush1.bf16.msra.mxu0 %v1825_v17  ;;  %1699 = vmatpush3.bf16.msra.mxu1 %v1856_v39  ;;  %v97_v4 = vrot.slane %v84_v61, %v96_v63  ;;  %v101_v7 = vrot.slane %v84_v61, %v100_v1 }
  0x63   :  { %1021 = vmatprep.subr.bf16.mxu0 %v1830_v18  ;;  %1700 = vmatprep.subr.bf16.mxu1 %v1860_v41 }
  0x66   :  { %1022 = vmatpush1.bf16.msra.mxu0 %v1828_v19  ;;  %1701 = vmatpush3.bf16.msra.mxu1 %v1861_v43 }
  0x67   :  { %1023 = vmatprep.subr.bf16.mxu0 %v1833_v20  ;;  %1702 = vmatprep.subr.bf16.mxu1 %v1865_v45 }
  0x6a   :  { %1024 = vmatpush1.bf16.msra.mxu0 %v1831_v21  ;;  %1703 = vmatpush3.bf16.msra.mxu1 %v1866_v47 }
  0x6b   :  { %1025 = vmatprep.subr.bf16.mxu0 %v1836_v22  ;;  %1704 = vmatprep.subr.bf16.mxu1 %v1870_v49 }
  0x6e   :  { %1026 = vmatpush1.bf16.msra.mxu0 %v1834_v23  ;;  %1705 = vmatpush3.bf16.msra.mxu1 %v1871_v51 }
  0x6f   :  { %1027 = vmatprep.subr.bf16.mxu0 %v1839_v24  ;;  %1706 = vmatprep.subr.bf16.mxu1 %v1875_v53 }
  0x72   :  { %1028 = vmatpush1.bf16.msra.mxu0 %v1837_v26  ;;  %1707 = vmatpush3.bf16.msra.mxu1 %v1876_v55 }
  0x73   :  { %1029 = vmatprep.subr.bf16.mxu0 %v1844_v28  ;;  %1714 = vmatprep.subr.bf16.mxu1 %v1880_v57 }
  0x76   :  { %1030 = vmatpush1.bf16.msra.mxu0 %v1842_v30 }
  0x77   :  { %1031 = vmatprep.subr.bf16.mxu0 %v1849_v32 }
  0x7a   :  { %1032 = vmatpush1.bf16.msra.mxu0 %v1847_v34 }
  0x7b   :  { %1033 = vmatprep.subr.bf16.mxu0 %v1854_v36 }
  0x7e   :  { %1034 = vmatpush1.bf16.msra.mxu0 %v1852_v38 }
  0x7f   :  { %1035 = vmatprep.subr.bf16.mxu0 %v1859_v40 }
  0x82   :  { %1036 = vmatpush1.bf16.msra.mxu0 %v1857_v42 }
  0x83   :  { %1037 = vmatprep.subr.bf16.mxu0 %v1864_v44 }
  0x86   :  { %1038 = vmatpush1.bf16.msra.mxu0 %v1862_v46 }
  0x87   :  { %1039 = vmatprep.subr.bf16.mxu0 %v1869_v48 }
  0x8a   :  { %1040 = vmatpush1.bf16.msra.mxu0 %v1867_v50 }
  0x8b   :  { %1041 = vmatprep.subr.bf16.mxu0 %v1874_v52 }
  0x8e   :  { %1042 = vmatpush1.bf16.msra.mxu0 %v1872_v54 }
  0x8f   :  { %1054 = vmatprep.subr.bf16.mxu0 %v1879_v56 }
 0x124   :  { %v178_v3 = vpop.f32.mrb[0].mxu0 }
 0x125   :  { %v2251_v5 = vadd.f32 %v178_v3, %v89_v0  ;;  %v180_v6 = vpop.f32.mrb[1].mxu0 }
 0x126   :  { %v2253_v8 = vadd.f32 %v180_v6, %v93_v2  ;;  %v182_v9 = vpop.f32.mrb[2].mxu0  ;;  %v221_v13 = vpop.f32.mrb[0].mxu1 }
 0x127   :  { %v238_v10 = vand.u32 2147483647, %v2251_v5  ;;  %v2256_v11 = vadd.f32 %v182_v9, %v89_v0  ;;  %v184_v12 = vpop.f32.mrb[3].mxu0  ;;  %v2261_v16 = vadd.f32 %v221_v13, %v97_v4  ;;  %v223_v17 = vpop.f32.mrb[1].mxu1  ;;  %v230_v54 = vmax.f32 %v2251_v5, 0.0 }
 0x128   :  { %v239_v14 = vand.u32 2147483647, %v2253_v8  ;;  %v2259_v15 = vadd.f32 %v184_v12, %v93_v2  ;;  %v2264_v20 = vadd.f32 %v223_v17, %v101_v7  ;;  %v225_v21 = vpop.f32.mrb[2].mxu1  ;;  %v231_v58 = vmax.f32 %v2253_v8, 0.0 }
 0x129   :  { %v246_v18 = vsub.f32 0.0, %v238_v10  ;;  %v242_v19 = vand.u32 2147483647, %v2256_v11  ;;  %v227_v24 = vpop.f32.mrb[3].mxu1  ;;  %v240_v27 = vand.u32 2147483647, %v2261_v16  ;;  %v2269_v31 = vadd.f32 %v225_v21, %v97_v4 }
 0x12a   :  { %v247_v22 = vsub.f32 0.0, %v239_v14  ;;  %v243_v23 = vand.u32 2147483647, %v2259_v15  ;;  %v241_v30 = vand.u32 2147483647, %v2264_v20  ;;  %v2271_v34 = vadd.f32 %v227_v24, %v101_v7 }
 0x12b   :  { %v254_v25 = vmul.f32 1.442695, %v246_v18  ;;  %v250_v26 = vsub.f32 0.0, %v242_v19  ;;  %v248_v33 = vsub.f32 0.0, %v240_v27  ;;  %v244_v38 = vand.u32 2147483647, %v2269_v31 }
 0x12c   :  { %v256_v28 = vmul.f32 1.442695, %v247_v22  ;;  %v251_v29 = vsub.f32 0.0, %v243_v23  ;;  %v249_v36 = vsub.f32 0.0, %v241_v30  ;;  %v245_v40 = vand.u32 2147483647, %v2271_v34 }
 0x12d   :  { %1965 = vpow2.f32 %v254_v25  ;;  %v262_v32 = vmul.f32 1.442695, %v250_v26  ;;  %v258_v37 = vmul.f32 1.442695, %v248_v33  ;;  %v252_v41 = vsub.f32 0.0, %v244_v38 }
 0x12e   :  { %1967 = vpow2.f32 %v256_v28  ;;  %v264_v35 = vmul.f32 1.442695, %v251_v29  ;;  %v260_v39 = vmul.f32 1.442695, %v249_v36  ;;  %v253_v42 = vsub.f32 0.0, %v245_v40 }
 0x12f   :  { %1969 = vpow2.f32 %v262_v32  ;;  %v266_v43 = vmul.f32 1.442695, %v252_v41  ;;  %v234_v6 = vmax.f32 %v2256_v11, 0.0  ;;  %v235_v7 = vmax.f32 %v2259_v15, 0.0 }
 0x130   :  { %1971 = vpow2.f32 %v264_v35  ;;  %v268_v44 = vmul.f32 1.442695, %v253_v42  ;;  %v232_v9 = vmax.f32 %v2261_v16, 0.0  ;;  %v233_v10 = vmax.f32 %v2264_v20, 0.0  ;;  %v1887_v20 = vld [vmem:[#allocation2 + $0x1b0] ss:$12 sps:$4 sm:$0xff]  }
 0x131   :  { %1973 = vpow2.f32 %v258_v37 }
 0x132   :  { %1975 = vpow2.f32 %v260_v39 }
 0x133   :  { %1977 = vpow2.f32 %v266_v43 }
 0x134   :  { %1979 = vpow2.f32 %v268_v44 }
 0x137   :  { %v1966_v45 = vpop.eup %1965 }
 0x138   :  { %v1968_v46 = vpop.eup %1967  ;;  %v270_v47 = vadd.f32 1.0, %v1966_v45  ;;  %v273_v51 = vmul.f32 -0.5, %v1966_v45  ;;  %v276_v57 = vand.u32 2147483647, %v1966_v45 }
 0x139   :  { %v1970_v48 = vpop.eup %1969  ;;  %v279_v49 = vadd.f32 1.0, %v1968_v46  ;;  %v282_v61 = vmul.f32 -0.5, %v1968_v46  ;;  %v285_v0 = vand.u32 2147483647, %v1968_v46 }
 0x13a   :  { %v1972_v50 = vpop.eup %1971  ;;  %1981 = vlog2.f32 %v270_v47  ;;  %v306_v52 = vadd.f32 1.0, %v1970_v48  ;;  %v274_v1 = vadd.f32 1.0, %v273_v51  ;;  %v309_v2 = vmul.f32 -0.5, %v1970_v48 }
 0x13b   :  { %v1974_v53 = vpop.eup %1973  ;;  %1983 = vlog2.f32 %v279_v49  ;;  %v315_v55 = vadd.f32 1.0, %v1972_v50  ;;  %v318_v13 = vmul.f32 -0.5, %v1972_v50  ;;  %vm2288_vm2 = vcmp.lt.f32.partialorder %v276_v57, 0.0004427343 }
 0x13c   :  { %1985 = vlog2.f32 %v306_v52  ;;  %v2276_v56 = vpop.eup %1975  ;;  %v288_v3 = vadd.f32 1.0, %v1974_v53  ;;  %v291_v14 = vmul.f32 -0.5, %v1974_v53  ;;  %v283_v19 = vadd.f32 1.0, %v282_v61  ;;  %v1905_v52 = vld [vmem:[#allocation2 + $0x2c0] ss:$12 sps:$4 sm:$0xff]  }
 0x13d   :  { %1987 = vlog2.f32 %v315_v55  ;;  %v2279_v4 = vpop.eup %1977  ;;  %v297_v17 = vadd.f32 1.0, %v2276_v56  ;;  %v312_v21 = vand.u32 2147483647, %v1970_v48  ;;  %v275_v15 = vmul.f32 %v1966_v45, %v274_v1  ;;  %v1899_v45 = vld [vmem:[#allocation2 + $0x1e4] ss:$12 sps:$4 sm:$0xff]  }
 0x13e   :  { %v2285_v12 = vpop.eup %1979  ;;  %1989 = vlog2.f32 %v288_v3  ;;  %v324_v11 = vadd.f32 1.0, %v2279_v4  ;;  %vm2293_vm3 = vcmp.lt.f32.partialorder %v285_v0, 0.0004427343  ;;  %v310_v23 = vadd.f32 1.0, %v309_v2 }
 0x13f   :  { %1991 = vlog2.f32 %v297_v17  ;;  %v321_v24 = vand.u32 2147483647, %v1972_v50  ;;  %v300_v25 = vmul.f32 -0.5, %v2276_v56  ;;  %v333_v26 = vadd.f32 1.0, %v2285_v12 }
 0x140   :  { %1993 = vlog2.f32 %v324_v11  ;;  %v319_v28 = vadd.f32 1.0, %v318_v13  ;;  %v292_v29 = vadd.f32 1.0, %v291_v14  ;;  %v294_v30 = vand.u32 2147483647, %v1974_v53  ;;  %v1877_v11 = vld [vmem:[#allocation2 + $0x180] ss:$12 sps:$4 sm:$0xff]  }
 0x141   :  { %v327_v32 = vmul.f32 -0.5, %v2279_v4  ;;  %v284_v36 = vmul.f32 %v1968_v46, %v283_v19  ;;  %vm2300_vm4 = vcmp.lt.f32.partialorder %v312_v21, 0.0004427343  ;;  %1995 = vlog2.f32 %v333_v26  ;;  %v1881_v26 = vld [vmem:[#allocation2 + $0x188] ss:$12 sps:$4 sm:$0xff]  }
 0x142   :  { %v311_v40 = vmul.f32 %v1970_v48, %v310_v23  ;;  %v303_v41 = vand.u32 2147483647, %v2276_v56  ;;  %v336_v42 = vmul.f32 -0.5, %v2285_v12  ;;  %vm2308_vm5 = vcmp.lt.f32.partialorder %v321_v24, 0.0004427343 }
 0x143   :  { %v301_v46 = vadd.f32 1.0, %v300_v25  ;;  %v320_v49 = vmul.f32 %v1972_v50, %v319_v28  ;;  %v293_v51 = vmul.f32 %v1974_v53, %v292_v29  ;;  %vm2312_vm6 = vcmp.lt.f32.partialorder %v294_v30, 0.0004427343  ;;  %v1885_v30 = vld [vmem:[#allocation2 + $0x260] ss:$12 sps:$4 sm:$0xff]  }
 0x144   :  { %v1982_v27 = vpop.eup %1981  ;;  %v328_v48 = vadd.f32 1.0, %v327_v32  ;;  %v330_v0 = vand.u32 2147483647, %v2279_v4  ;;  %vm2323_vm7 = vcmp.lt.f32.partialorder %v303_v41, 0.0004427343  ;;  %v337_v3 = vadd.f32 1.0, %v336_v42 }
 0x145   :  { %v1984_v33 = vpop.eup %1983  ;;  %v272_v35 = vmul.f32 0.6931472, %v1982_v27  ;;  %v302_v17 = vmul.f32 %v2276_v56, %v301_v46  ;;  %v339_v18 = vand.u32 2147483647, %v2285_v12  ;;  %v236_v24 = vmax.f32 %v2269_v31, 0.0  ;;  %v1949_v31 = vld [vmem:[#allocation6 + $0x60] sm:$0xff]  }
 0x146   :  { %v1986_v38 = vpop.eup %1985  ;;  %v281_v39 = vmul.f32 0.6931472, %v1984_v33  ;;  %vm2337_vm8 = vcmp.lt.f32.partialorder %v330_v0, 0.0004427343  ;;  %v338_v8 = vmul.f32 %v2285_v12, %v337_v3  ;;  %v237_v29 = vmax.f32 %v2271_v34, 0.0 }
 0x147   :  { %v278_v43 = vsel %vm2288_vm2, %v275_v15, %v272_v35  ;;  %v308_v44 = vmul.f32 0.6931472, %v1986_v38  ;;  %v1988_v47 = vpop.eup %1987  ;;  %vm2347_vm9 = vcmp.lt.f32.partialorder %v339_v18, 0.0004427343  ;;  %v1882_v33 = vld [vmem:[#allocation2 + $0x198] ss:$12 sps:$4 sm:$0xff]  }
 0x148   :  { %v287_v55 = vsel %vm2293_vm3, %v284_v36, %v281_v39  ;;  %v317_v61 = vmul.f32 0.6931472, %v1988_v47  ;;  %v1990_v1 = vpop.eup %1989  ;;  %v342_v2 = vadd.f32 %v278_v43, %v230_v54  ;;  %v1886_v35 = vld [vmem:[#allocation2 + $0x1a0] ss:$12 sps:$4 sm:$0xff]   ;;  %v1890_v39 = vld [vmem:[#allocation2 + $0x278] ss:$12 sps:$4 sm:$0xff]  }
 0x149   :  { %v314_v57 = vsel %vm2300_vm4, %v311_v40, %v308_v44  ;;  %v290_v14 = vmul.f32 0.6931472, %v1990_v1  ;;  %v1992_v19 = vpop.eup %1991  ;;  %v343_v21 = vadd.f32 %v287_v55, %v231_v58  ;;  %v1889_v38 = vld [vmem:[#allocation2 + $0x1b4] ss:$12 sps:$4 sm:$0xff]   ;;  %v1894_v41 = vld [vmem:[#allocation2 + $0x1cc] ss:$12 sps:$4 sm:$0xff]  }
 0x14a   :  { %v346_v50 = vadd.f32 %v314_v57, %v234_v6  ;;  %v323_v13 = vsel %vm2308_vm5, %v320_v49, %v317_v61  ;;  %v329_v6 = vmul.f32 %v2279_v4, %v328_v48  ;;  %v1994_v15 = vpop.eup %1993  ;;  %v299_v23 = vmul.f32 0.6931472, %v1992_v19  ;;  %v1895_v42 = vld [vmem:[#allocation2 + $0x290] ss:$12 sps:$4 sm:$0xff]   ;;  %v1892_v43 = vld [vmem:[#allocation2 + $0x1c8] ss:$12 sps:$4 sm:$0xff]  }
 0x14b   :  { %v347_v54 = vadd.f32 %v323_v13, %v235_v7  ;;  %v296_v22 = vsel %vm2312_vm6, %v293_v51, %v290_v14  ;;  %v326_v25 = vmul.f32 0.6931472, %v1994_v15  ;;  %v1884_v7 = vld [vmem:[#allocation2 + $0x19c] ss:$12 sps:$4 sm:$0xff]   ;;  %v1996_v27 = vpop.eup %1995  ;;  %v1897_v47 = vld [vmem:[#allocation2 + $0x1e0] ss:$12 sps:$4 sm:$0xff]  }
 0x14c   :  { %v350_v5 = vpack.c.bf16 %v346_v50, %v342_v2  ;;  %v344_v4 = vadd.f32 %v296_v22, %v232_v9  ;;  %v305_v28 = vsel %vm2323_vm7, %v302_v17, %v299_v23  ;;  %v335_v32 = vmul.f32 0.6931472, %v1996_v27  ;;  %v1896_v44 = vld [vmem:[#allocation2 + $0x1d0] ss:$12 sps:$4 sm:$0xff]   ;;  %v1900_v46 = vld [vmem:[#allocation2 + $0x2a8] ss:$12 sps:$4 sm:$0xff]  }
 0x14d   :  { %v351_v58 = vpack.c.bf16 %v347_v54, %v343_v21  ;;  %v332_v12 = vsel %vm2337_vm8, %v329_v6, %v326_v25  ;;  %v345_v16 = vadd.f32 %v305_v28, %v233_v10  ;;  %v1891_v10 = vld [vmem:[#allocation2 + $0x1b8] ss:$12 sps:$4 sm:$0xff]   ;;  %v1901_v49 = vld [vmem:[#allocation2 + $0x1e8] ss:$12 sps:$4 sm:$0xff]   ;;  %v1906_v55 = vld [vmem:[#allocation2 + $0x200] ss:$12 sps:$4 sm:$0xff]  }
 0x14e   :  { %v348_v9 = vadd.f32 %v332_v12, %v236_v24  ;;  %v341_v34 = vsel %vm2347_vm9, %v338_v8, %v335_v32  ;;  %v1904_v51 = vld [vmem:[#allocation2 + $0x1fc] ss:$12 sps:$4 sm:$0xff]   ;;  %v1902_v48 = vld [vmem:[#allocation2 + $0x1f8] ss:$12 sps:$4 sm:$0xff]   ;;  %v1909_v57 = vld [vmem:[#allocation2 + $0x214] ss:$12 sps:$4 sm:$0xff]  }
 0x14f   :  { %1043 = vmatprep.mubr.bf16.mxu0 %v351_v58  ;;  %1129 = vmatprep.mubr.bf16.mxu1 %v351_v58  ;;  %v349_v37 = vadd.f32 %v341_v34, %v237_v29  ;;  %v1910_v61 = vld [vmem:[#allocation2 + $0x2d8] ss:$12 sps:$4 sm:$0xff]   ;;  %v1907_v0 = vld [vmem:[#allocation2 + $0x210] ss:$12 sps:$4 sm:$0xff]   ;;  %v1912_v53 = vld [vmem:[#allocation2 + $0x228] ss:$12 sps:$4 sm:$0xff]  }
 0x150   :  { %1044 = vmatmul.mubr.bf16.vlgmr.msra.gmra.mrb[4].mxu0 %v350_v5  ;;  %1130 = vmatmul.mubr.bf16.vlgmr.msra.gmra.mrb[4].mxu1 %v350_v5  ;;  %v2357_v36 = vpack.c.bf16 %v348_v9, %v344_v4  ;;  %v1911_v1 = vld [vmem:[#allocation2 + $0x218] ss:$12 sps:$4 sm:$0xff]   ;;  %v1915_v50 = vld [vmem:[#allocation2 + $0x2f0] ss:$12 sps:$4 sm:$0xff]   ;;  %v1917_v14 = vld [vmem:[#allocation2 + $0x240] ss:$12 sps:$4 sm:$0xff]  }
 0x151   :  { %1055 = vmatpush1.bf16.msra.mxu0 %v1877_v11  ;;  %1715 = vmatpush3.bf16.msra.mxu1 %v1881_v26  ;;  %v353_v40 = vpack.c.bf16 %v349_v37, %v345_v16  ;;  %v1914_v2 = vld [vmem:[#allocation2 + $0x22c] ss:$12 sps:$4 sm:$0xff]   ;;  %v1916_v3 = vld [vmem:[#allocation2 + $0x230] ss:$12 sps:$4 sm:$0xff]   ;;  %v1925_v19 = vld [vmem:[#allocation2 + $0x274] ss:$12 sps:$4 sm:$0xff]  }
 0x152   :  { %1056 = vmatprep.subr.bf16.mxu0 %v1884_v7  ;;  %1716 = vmatprep.subr.bf16.mxu1 %v1885_v30  ;;  %v1919_v13 = vld [vmem:[#allocation2 + $0x244] ss:$12 sps:$4 sm:$0xff]   ;;  %v1922_v17 = vld [vmem:[#allocation2 + $0x25c] ss:$12 sps:$4 sm:$0xff]   ;;  %v1928_v5 = vld [vmem:[#allocation2 + $0x28c] ss:$12 sps:$4 sm:$0xff]  }
 0x153   :  { %1086 = vmatprep.mubr.bf16.mxu0 %v353_v40  ;;  %1170 = vmatprep.mubr.bf16.mxu1 %v353_v40  ;;  %v1920_v18 = vld [vmem:[#allocation2 + $0x258] ss:$12 sps:$4 sm:$0xff]   ;;  %v1923_v21 = vld [vmem:[#allocation2 + $0x270] ss:$12 sps:$4 sm:$0xff]   ;;  %v1926_v54 = vld [vmem:[#allocation2 + $0x288] ss:$12 sps:$4 sm:$0xff]  }
 0x154   :  { %v1931_v6 = vld [vmem:[#allocation2 + $0x2a4] ss:$12 sps:$4 sm:$0xff]   ;;  %v1929_v11 = vld [vmem:[#allocation2 + $0x2a0] ss:$12 sps:$4 sm:$0xff]   ;;  %v1934_v15 = vld [vmem:[#allocation2 + $0x2bc] ss:$12 sps:$4 sm:$0xff]  }
 0x155   :  { %1057 = vmatpush1.bf16.msra.mxu0 %v1882_v33  ;;  %1717 = vmatpush3.bf16.msra.mxu1 %v1886_v35  ;;  %v1932_v22 = vld [vmem:[#allocation2 + $0x2b8] ss:$12 sps:$4 sm:$0xff]   ;;  %v1937_v23 = vld [vmem:[#allocation2 + $0x2d4] ss:$12 sps:$4 sm:$0xff]   ;;  %v1935_v24 = vld [vmem:[#allocation2 + $0x2d0] ss:$12 sps:$4 sm:$0xff]  }
 0x156   :  { %1058 = vmatprep.subr.bf16.mxu0 %v1889_v38  ;;  %1718 = vmatprep.subr.bf16.mxu1 %v1890_v39  ;;  %v1940_v56 = vld [vmem:[#allocation2 + $0x2ec] ss:$12 sps:$4 sm:$0xff]   ;;  %v1938_v25 = vld [vmem:[#allocation2 + $0x2e8] ss:$12 sps:$4 sm:$0xff]   ;;  %v1947_v28 = vld [vmem:[#allocation6 + $0x58] sm:$0xff]   ;;  %v2124_v35 = vmov 0.0  }
 0x157   :  { %v1941_v8 = vld [vmem:[#allocation6 + $0x40] sm:$0xff]   ;;  %v1943_v26 = vld [vmem:[#allocation6 + $0x48] sm:$0xff]   ;;  %v1945_v27 = vld [vmem:[#allocation6 + $0x50] sm:$0xff]  }
 0x158   :  { %v1942_v58 = vld [vmem:[#allocation6] sm:$0xff]   ;;  %v1944_v7 = vld [vmem:[#allocation6 + $0x8] sm:$0xff]   ;;  %v1946_v4 = vld [vmem:[#allocation6 + $0x10] sm:$0xff]  }
 0x159   :  { %1059 = vmatpush1.bf16.msra.mxu0 %v1887_v20  ;;  %1719 = vmatpush3.bf16.msra.mxu1 %v1891_v10  ;;  %v1948_v29 = vld [vmem:[#allocation6 + $0x18] sm:$0xff]   ;;  %v1950_v30 = vld [vmem:[#allocation6 + $0x20] sm:$0xff]   ;;  %v1951_v12 = vld [vmem:[#allocation6 + $0x68] sm:$0xff]  }
 0x15a   :  { %1060 = vmatprep.subr.bf16.mxu0 %v1894_v41  ;;  %1720 = vmatprep.subr.bf16.mxu1 %v1895_v42  ;;  %v1952_v32 = vld [vmem:[#allocation6 + $0x28] sm:$0xff]   ;;  %v1953_v16 = vld [vmem:[#allocation6 + $0x70] sm:$0xff]   ;;  %v1955_v34 = vld [vmem:[#allocation6 + $0x78] sm:$0xff]  }
 0x15b   :  { %v1954_v9 = vld [vmem:[#allocation6 + $0x30] sm:$0xff]   ;;  %v1956_v33 = vld [vmem:[#allocation6 + $0x38] sm:$0xff]  }
 0x15c   :  { %v482_v10 = vld [vmem:[#allocation4] sm:$0x7] }
 0x15d   :  { %1061 = vmatpush1.bf16.msra.mxu0 %v1892_v43  ;;  %1721 = vmatpush3.bf16.msra.mxu1 %v1896_v44  ;;  %v495_v41 = vrot.slane %v482_v10, %v96_v63 }
 0x15e   :  { %1062 = vmatprep.subr.bf16.mxu0 %v1899_v45  ;;  %1722 = vmatprep.subr.bf16.mxu1 %v1900_v46 }
 0x161   :  { %1063 = vmatpush1.bf16.msra.mxu0 %v1897_v47  ;;  %1723 = vmatpush3.bf16.msra.mxu1 %v1901_v49 }
 0x162   :  { %1064 = vmatprep.subr.bf16.mxu0 %v1904_v51  ;;  %1724 = vmatprep.subr.bf16.mxu1 %v1905_v52 }
 0x165   :  { %1065 = vmatpush1.bf16.msra.mxu0 %v1902_v48  ;;  %1725 = vmatpush3.bf16.msra.mxu1 %v1906_v55 }
 0x166   :  { %1066 = vmatprep.subr.bf16.mxu0 %v1909_v57  ;;  %1726 = vmatprep.subr.bf16.mxu1 %v1910_v61 }
 0x169   :  { %1067 = vmatpush1.bf16.msra.mxu0 %v1907_v0  ;;  %1727 = vmatpush3.bf16.msra.mxu1 %v1911_v1 }
 0x16a   :  { %1068 = vmatprep.subr.bf16.mxu0 %v1914_v2  ;;  %1728 = vmatprep.subr.bf16.mxu1 %v1915_v50 }
 0x16d   :  { %1069 = vmatpush1.bf16.msra.mxu0 %v1912_v53  ;;  %1729 = vmatpush3.bf16.msra.mxu1 %v1916_v3 }
 0x16e   :  { %1070 = vmatprep.subr.bf16.mxu0 %v1919_v13  ;;  %1736 = vmatprep.subr.bf16.mxu1 %v1941_v8 }
 0x170   :  { %1171 = vmatmul.mubr.bf16.vlgmr.msra.gmra.mrb[8].mxu1 %v2357_v36 }
 0x171   :  { %1071 = vmatpush1.bf16.msra.mxu0 %v1917_v14  ;;  %1737 = vmatpush3.bf16.msra.mxu1 %v1942_v58  ;;  %v487_v14 = vrot.slane %v482_v10, %v88_v60 }
 0x172   :  { %1072 = vmatprep.subr.bf16.mxu0 %v1922_v17  ;;  %1738 = vmatprep.subr.bf16.mxu1 %v1943_v26 }
 0x175   :  { %1073 = vmatpush1.bf16.msra.mxu0 %v1920_v18  ;;  %1739 = vmatpush3.bf16.msra.mxu1 %v1944_v7  ;;  %v491_v18 = vrot.slane %v482_v10, %v92_v62 }
 0x176   :  { %1074 = vmatprep.subr.bf16.mxu0 %v1925_v19  ;;  %1740 = vmatprep.subr.bf16.mxu1 %v1945_v27 }
 0x179   :  { %1075 = vmatpush1.bf16.msra.mxu0 %v1923_v21  ;;  %1741 = vmatpush3.bf16.msra.mxu1 %v1946_v4 }
 0x17a   :  { %1076 = vmatprep.subr.bf16.mxu0 %v1928_v5  ;;  %1742 = vmatprep.subr.bf16.mxu1 %v1947_v28 }
 0x17d   :  { %1077 = vmatpush1.bf16.msra.mxu0 %v1926_v54  ;;  %1743 = vmatpush3.bf16.msra.mxu1 %v1948_v29 }
 0x17e   :  { %1078 = vmatprep.subr.bf16.mxu0 %v1931_v6  ;;  %1744 = vmatprep.subr.bf16.mxu1 %v1949_v31 }
 0x181   :  { %1079 = vmatpush1.bf16.msra.mxu0 %v1929_v11  ;;  %1745 = vmatpush3.bf16.msra.mxu1 %v1950_v30 }
 0x182   :  { %1080 = vmatprep.subr.bf16.mxu0 %v1934_v15  ;;  %1746 = vmatprep.subr.bf16.mxu1 %v1951_v12 }
 0x185   :  { %1081 = vmatpush1.bf16.msra.mxu0 %v1932_v22  ;;  %1747 = vmatpush3.bf16.msra.mxu1 %v1952_v32 }
 0x186   :  { %1082 = vmatprep.subr.bf16.mxu0 %v1937_v23  ;;  %1748 = vmatprep.subr.bf16.mxu1 %v1953_v16 }
 0x189   :  { %1083 = vmatpush1.bf16.msra.mxu0 %v1935_v24  ;;  %1749 = vmatpush3.bf16.msra.mxu1 %v1954_v9 }
 0x18a   :  { %1084 = vmatprep.subr.bf16.mxu0 %v1940_v56  ;;  %1750 = vmatprep.subr.bf16.mxu1 %v1955_v34 }
 0x18d   :  { %1085 = vmatpush1.bf16.msra.mxu0 %v1938_v25  ;;  %1751 = vmatpush3.bf16.msra.mxu1 %v1956_v33 }
 0x18e   :  { %1767 = vmatprep.subr.bf16.mxu1 %v2124_v35 }
 0x190   :  { %1087 = vmatmul.mubr.bf16.vlgmr.msra.gmra.mrb[4].mxu0 %v2357_v36 }
 0x223   :  { %v1708_v36 = vpop.f32.mrb[4].mxu1 }
 0x224   :  { %v1709_v37 = vpop.f32.mrb[5].mxu1 }
 0x225   :  { %v1710_v38 = vadd.f32 %v1709_v37, %v1708_v36  ;;  %v1711_v39 = vpop.f32.mrb[6].mxu1 }
 0x226   :  { %v1712_v40 = vpop.f32.mrb[7].mxu1 }
 0x227   :  { %v1713_v20 = vadd.f32 %v1712_v40, %v1711_v39  ;;  %v1132_v44 = vadd.f32 %v1710_v38, %v495_v41 }
 0x229   :  { %v1135_v49 = vadd.f32 %v1713_v20, %v495_v41 }
 0x243   :  { %v1730_v42 = vpop.f32.mrb[8].mxu1 }
 0x244   :  { %v1731_v43 = vpop.f32.mrb[9].mxu1 }
 0x245   :  { %v1732_v45 = vadd.f32 %v1731_v43, %v1730_v42  ;;  %v1733_v46 = vpop.f32.mrb[10].mxu1 }
 0x246   :  { %v1734_v47 = vpop.f32.mrb[11].mxu1 }
 0x247   :  { %v1173_v51 = vadd.f32 %v1732_v45, %v1132_v44  ;;  %v1735_v52 = vadd.f32 %v1734_v47, %v1733_v46 }
 0x249   :  { %v1187_v48 = vand.u32 2147483647, %v1173_v51  ;;  %v1176_v55 = vadd.f32 %v1735_v52, %v1135_v49  ;;  %v1181_v27 = vmax.f32 %v1173_v51, 0.0 }
 0x24b   :  { %v1193_v57 = vsub.f32 0.0, %v1187_v48  ;;  %v1190_v61 = vand.u32 2147483647, %v1176_v55  ;;  %v1184_v32 = vmax.f32 %v1176_v55, 0.0 }
 0x24d   :  { %v1201_v0 = vmul.f32 1.442695, %v1193_v57  ;;  %v1196_v1 = vsub.f32 0.0, %v1190_v61 }
 0x24f   :  { %1997 = vpow2.f32 %v1201_v0  ;;  %v1207_v2 = vmul.f32 1.442695, %v1196_v1 }
 0x251   :  { %1999 = vpow2.f32 %v1207_v2 }
 0x259   :  { %v1998_v50 = vpop.eup %1997 }
 0x25a   :  { %v1227_v63 = vadd.f32 1.0, %v1998_v50  ;;  %v1230_v13 = vmul.f32 -0.5, %v1998_v50  ;;  %v1233_v19 = vand.u32 2147483647, %v1998_v50 }
 0x25b   :  { %v2000_v53 = vpop.eup %1999 }
 0x25c   :  { %2001 = vlog2.f32 %v1227_v63  ;;  %v1254_v3 = vadd.f32 1.0, %v2000_v53  ;;  %v1257_v17 = vmul.f32 -0.5, %v2000_v53  ;;  %v1231_v21 = vadd.f32 1.0, %v1230_v13 }
 0x25d   :  { %v1260_v54 = vand.u32 2147483647, %v2000_v53  ;;  %vm2372_vm10 = vcmp.lt.f32.partialorder %v1233_v19, 0.0004427343 }
 0x25e   :  { %2003 = vlog2.f32 %v1254_v3  ;;  %v1258_v15 = vadd.f32 1.0, %v1257_v17  ;;  %v1232_v8 = vmul.f32 %v1998_v50, %v1231_v21 }
 0x25f   :  { %vm1261_vm11 = vcmp.lt.f32.partialorder %v1260_v54, 0.0004427343 }
 0x260   :  { %v1259_v30 = vmul.f32 %v2000_v53, %v1258_v15 }
 0x263   :  { %v1088_v5 = vpop.f32.mrb[4].mxu0 }
 0x264   :  { %v2368_v6 = vadd.f32 %v1088_v5, %v487_v14  ;;  %v1090_v11 = vpop.f32.mrb[5].mxu0 }
 0x265   :  { %v2370_v22 = vadd.f32 %v1090_v11, %v491_v18  ;;  %v1092_v23 = vpop.f32.mrb[6].mxu0 }
 0x266   :  { %v2002_v24 = vpop.eup %2001  ;;  %v1185_v60 = vand.u32 2147483647, %v2368_v6  ;;  %v2377_v59 = vadd.f32 %v1092_v23, %v487_v14  ;;  %v1094_v62 = vpop.f32.mrb[7].mxu0  ;;  %v1179_v3 = vmax.f32 %v2368_v6, 0.0 }
 0x267   :  { %v1229_v25 = vmul.f32 0.6931472, %v2002_v24  ;;  %v1186_v58 = vand.u32 2147483647, %v2370_v22  ;;  %v2380_v26 = vadd.f32 %v1094_v62, %v491_v18  ;;  %v1180_v56 = vmax.f32 %v2370_v22, 0.0  ;;  %v1958_v22 = vld [vmem:[#allocation6 + $0x88] sm:$0xff]  }
 0x268   :  { %v2004_v7 = vpop.eup %2003  ;;  %v1191_v4 = vsub.f32 0.0, %v1185_v60  ;;  %v1188_v28 = vand.u32 2147483647, %v2377_v59  ;;  %v1182_v6 = vmax.f32 %v2377_v59, 0.0  ;;  %v1959_v59 = vld [vmem:[#allocation6 + $0x90] sm:$0xff]  }
 0x269   :  { %v1235_v29 = vsel %vm2372_vm10, %v1232_v8, %v1229_v25  ;;  %v1256_v31 = vmul.f32 0.6931472, %v2004_v7  ;;  %v1192_v12 = vsub.f32 0.0, %v1186_v58  ;;  %v1189_v34 = vand.u32 2147483647, %v2380_v26 }
 0x26a   :  { %v1197_v16 = vmul.f32 1.442695, %v1191_v4  ;;  %v1194_v9 = vsub.f32 0.0, %v1188_v28  ;;  %v2386_v33 = vadd.f32 %v1235_v29, %v1181_v27  ;;  %v1183_v27 = vmax.f32 %v2380_v26, 0.0  ;;  %v1960_v26 = vld [vmem:[#allocation6 + $0x98] sm:$0xff]  }
 0x26b   :  { %v1262_v36 = vsel %vm1261_vm11, %v1259_v30, %v1256_v31  ;;  %v1199_v37 = vmul.f32 1.442695, %v1192_v12  ;;  %v1195_v40 = vsub.f32 0.0, %v1189_v34  ;;  %v1957_v12 = vld [vmem:[#allocation6 + $0x80] sm:$0xff]   ;;  %v1964_v34 = vld [vmem:[#allocation6 + $0xb8] sm:$0xff]  }
 0x26c   :  { %v2388_v38 = vadd.f32 %v1262_v36, %v1184_v32  ;;  %2005 = vpow2.f32 %v1197_v16  ;;  %v1203_v39 = vmul.f32 1.442695, %v1194_v9  ;;  %v1961_v32 = vld [vmem:[#allocation6 + $0xa0] sm:$0xff]   ;;  %v1962_v16 = vld [vmem:[#allocation6 + $0xa8] sm:$0xff]   ;;  %v1963_v9 = vld [vmem:[#allocation6 + $0xb0] sm:$0xff]  }
 0x26d   :  { %2007 = vpow2.f32 %v1199_v37  ;;  %v1205_v20 = vmul.f32 1.442695, %v1195_v40 }
 0x26e   :  { %2009 = vpow2.f32 %v1203_v39  ;;  %v1271_v10 = vpack.c.bf16 %v2388_v38, %v2386_v33 }
 0x26f   :  { %2011 = vpow2.f32 %v1205_v20 }
 0x276   :  { %v2006_v41 = vpop.eup %2005 }
 0x277   :  { %v2008_v42 = vpop.eup %2007  ;;  %v1209_v43 = vadd.f32 1.0, %v2006_v41  ;;  %v1212_v51 = vmul.f32 -0.5, %v2006_v41  ;;  %v1215_v61 = vand.u32 2147483647, %v2006_v41 }
 0x278   :  { %v2010_v44 = vpop.eup %2009  ;;  %v1218_v45 = vadd.f32 1.0, %v2008_v42  ;;  %v1221_v52 = vmul.f32 -0.5, %v2008_v42  ;;  %v1224_v50 = vand.u32 2147483647, %v2008_v42 }
 0x279   :  { %2013 = vlog2.f32 %v1209_v43  ;;  %v1236_v46 = vadd.f32 1.0, %v2010_v44  ;;  %v2012_v47 = vpop.eup %2011  ;;  %v1239_v48 = vmul.f32 -0.5, %v2010_v44  ;;  %v1213_v55 = vadd.f32 1.0, %v1212_v51 }
 0x27a   :  { %2015 = vlog2.f32 %v1218_v45  ;;  %v1245_v49 = vadd.f32 1.0, %v2012_v47  ;;  %v1248_v57 = vmul.f32 -0.5, %v2012_v47  ;;  %v1222_v0 = vadd.f32 1.0, %v1221_v52 }
 0x27b   :  { %2017 = vlog2.f32 %v1236_v46  ;;  %v1240_v1 = vadd.f32 1.0, %v1239_v48  ;;  %v1242_v63 = vand.u32 2147483647, %v2010_v44  ;;  %v1214_v14 = vmul.f32 %v2006_v41, %v1213_v55 }
 0x27c   :  { %2019 = vlog2.f32 %v1245_v49  ;;  %v1249_v17 = vadd.f32 1.0, %v1248_v57  ;;  %vm2393_vm12 = vcmp.lt.f32.partialorder %v1215_v61, 0.0004427343  ;;  %v1251_v5 = vand.u32 2147483647, %v2012_v47 }
 0x27d   :  { %v1223_v11 = vmul.f32 %v2008_v42, %v1222_v0  ;;  %v1241_v23 = vmul.f32 %v2010_v44, %v1240_v1  ;;  %vm1225_vm13 = vcmp.lt.f32.partialorder %v1224_v50, 0.0004427343  ;;  %vm1243_vm14 = vcmp.lt.f32.partialorder %v1242_v63, 0.0004427343  ;;  %v1667_v42 = vld [vmem:[#allocation7] ss:$0 sm:$0xff] }
 0x27e   :  { %v1250_v8 = vmul.f32 %v2012_v47, %v1249_v17  ;;  %vm1252_vm15 = vcmp.lt.f32.partialorder %v1251_v5, 0.0004427343 }
 0x283   :  { %v2014_v2 = vpop.eup %2013 }
 0x284   :  { %v2016_v53 = vpop.eup %2015  ;;  %v1211_v13 = vmul.f32 0.6931472, %v2014_v2 }
 0x285   :  { %v2018_v18 = vpop.eup %2017  ;;  %v1220_v21 = vmul.f32 0.6931472, %v2016_v53 }
 0x286   :  { %v1217_v54 = vsel %vm2393_vm12, %v1214_v14, %v1211_v13  ;;  %v1238_v15 = vmul.f32 0.6931472, %v2018_v18  ;;  %v2020_v24 = vpop.eup %2019 }
 0x287   :  { %v1226_v60 = vsel %vm1225_vm13, %v1223_v11, %v1220_v21  ;;  %v1247_v25 = vmul.f32 0.6931472, %v2020_v24  ;;  %v1263_v58 = vadd.f32 %v1217_v54, %v1179_v3 }
 0x288   :  { %v1244_v62 = vsel %vm1243_vm14, %v1241_v23, %v1238_v15  ;;  %v1264_v28 = vadd.f32 %v1226_v60, %v1180_v56 }
 0x289   :  { %v1266_v7 = vadd.f32 %v1244_v62, %v1182_v6  ;;  %v1253_v4 = vsel %vm1252_vm15, %v1250_v8, %v1247_v25 }
 0x28a   :  { %v1267_v31 = vadd.f32 %v1253_v4, %v1183_v27 }
 0x28b   :  { %v1269_v29 = vpack.c.bf16 %v1266_v7, %v1263_v58 }
 0x28c   :  { %v1270_v30 = vpack.c.bf16 %v1267_v31, %v1264_v28 }
 0x28e   :  { %1503 = vmatprep.mubr.bf16.mxu1 %v1270_v30 }
 0x28f   :  { %1504 = vmatmul.mubr.bf16.vlgmr.msra.gmra.mrb[12].mxu1 %v1269_v29 }
 0x290   :  { %1768 = vmatpush3.bf16.msra.mxu1 %v1957_v12  ;;  %1783 = vmatprep.mubr.msk.bf16.mxu1 %vm2125_vm0, %v2124_v35 }
 0x291   :  { %1769 = vmatprep.subr.bf16.mxu1 %v2124_v35 }
 0x294   :  { %1770 = vmatpush3.bf16.msra.mxu1 %v1958_v22 }
 0x295   :  { %1771 = vmatprep.subr.bf16.mxu1 %v2124_v35 }
 0x298   :  { %1772 = vmatpush3.bf16.msra.mxu1 %v1959_v59 }
 0x299   :  { %1773 = vmatprep.subr.bf16.mxu1 %v2124_v35 }
 0x29c   :  { %1774 = vmatpush3.bf16.msra.mxu1 %v1960_v26 }
 0x29d   :  { %1775 = vmatprep.subr.bf16.mxu1 %v2124_v35 }
 0x2a0   :  { %1776 = vmatpush3.bf16.msra.mxu1 %v1961_v32 }
 0x2a1   :  { %1777 = vmatprep.subr.bf16.mxu1 %v2124_v35 }
 0x2a4   :  { %1778 = vmatpush3.bf16.msra.mxu1 %v1962_v16 }
 0x2a5   :  { %1779 = vmatprep.subr.bf16.mxu1 %v2124_v35 }
 0x2a8   :  { %1780 = vmatpush3.bf16.msra.mxu1 %v1963_v9 }
 0x2a9   :  { %1781 = vmatprep.subr.bf16.mxu1 %v2124_v35 }
 0x2ac   :  { %1782 = vmatpush3.bf16.msra.mxu1 %v1964_v34 }
 0x2af   :  { %1784 = vmatmul.mubr.bf16.vlgmr.msra.gmra.mrb[16].mxu1 %v1271_v10 }
 0x362   :  { %v1752_v36 = vpop.f32.mrb[12].mxu1 }
 0x363   :  { %v1753_v37 = vpop.f32.mrb[13].mxu1 }
 0x364   :  { %v1754_v39 = vadd.f32 %v1753_v37, %v1752_v36  ;;  %v1755_v40 = vpop.f32.mrb[14].mxu1 }
 0x365   :  { %v1756_v20 = vpop.f32.mrb[15].mxu1 }
 0x366   :  { %v1757_v41 = vadd.f32 %v1756_v20, %v1755_v40  ;;  %v1506_v43 = vadd.f32 %v1754_v39, %v1667_v42 }
 0x368   :  { %v1509_v47 = vadd.f32 %v1757_v41, %v1667_v42 }
 0x382   :  { %v1546_v44 = vpop.f32.mrb[16].mxu1 }
 0x383   :  { %v1547_v45 = vadd.f32 %v1546_v44, %v1506_v43  ;;  %v1785_v46 = vpop.f32.mrb[17].mxu1 }
 0x384   :  { %v1549_v49 = vpop.f32.mrb[18].mxu1 }
 0x385   :  { %1553 = vst [vmem:[%s2426_s7] sm:$0xff] %v1547_v45  ;;  %v1550_v35 = vadd.f32 %v1549_v49, %v1509_v47  ;;  %v1786_v33 = vpop.f32.mrb[19].mxu1 }
 0x387   :  { %1554 = vst [vmem:[%s2426_s7 + $0x8] sm:$0xff] %v1550_v35 }
 0x388   :  { %1559 = vsyncpa [#allocation3], 1 }
 0x389   :  { %1560 = vsyncpa [#allocation5], 1 }
 0x38a   :  { %1561 = vsyncpa [#allocation8], 1 }

</bundles_post_ra>
